<compile_context>
chip_gen: v7x
topology: tpu7x:2x2x1
jax: 0.10.0
libtpu: 0.0.40
codegen_flags: <defaults>
</compile_context>

<pallas_src>
import jax
import jax.numpy as jnp
from jax.experimental import pallas as pl
from jax.experimental.pallas import tpu as pltpu


_TILE_R_MAX = 4096     # slab rows per grid step  (= TILE_R*128*4 B = 2 MiB of x)
_MIN_SPLIT_R = 1024    # above this, force >= 2 grid steps (dual-TC sharding on v7x)


def _round_up(x: int, m: int) -> int:
    return ((x + m - 1) // m) * m


def _choose_tile_r(r: int, tile_r_max: int) -> int:
    # Always a multiple of 8 (sublane rule); partial blocks at the grid edge are
    # handled by Pallas' in-bounds read / masked writeback.
    tile_r = min(_round_up(r, 8), max(8, _round_up(tile_r_max, 8)))
    if r > _MIN_SPLIT_R and tile_r >= r:
        # Keep at least two grid steps so the "parallel" axis can shard across
        # both v7x TensorCores (harmless no-op on single-TC v5e/v6e).
        tile_r = _round_up(pl.cdiv(r, 2), 8)
    return tile_r


def _linear_kernel(slab_ref, wblk_ref, o_ref):
    # slab_ref: (TILE_R, 128)  -- G = 128//F consecutive x-rows packed per slab row
    # wblk_ref: (128, G)       -- block-diagonal replicated weight (resident)
    # o_ref   : (TILE_R, G)    -- element (r, g) == y[r*G + g]
    o_ref[...] = jnp.dot(
        slab_ref[...], wblk_ref[...], preferred_element_type=jnp.float32
    ).astype(o_ref.dtype)


def linear_forward(x: jax.Array, weight: jax.Array, *, tile_r_max: int = _TILE_R_MAX) -> jax.Array:
    """x: (batch, in_fea); weight: (1, in_fea) (PyTorch layout). Returns (batch, 1)."""
    batch, in_fea = x.shape
    assert weight.shape == (1, in_fea)
    # TODO(synk): in_fea > 128 would need a K-tiled matmul path; polynomial
    # regression uses a handful of features, so it is out of scope here.
    assert in_fea <= 128
    dtype = x.dtype
    itemsize = jnp.dtype(dtype).itemsize

    # Pad features to a power of two so F divides 128 (no-op for F in {1,2,4,...,128}).
    f_pad = in_fea if 128 % in_fea == 0 else pl.next_power_of_2(in_fea)
    g = 128 // f_pad                       # x-rows packed per 128-lane slab row

    x_p = x
    if f_pad != in_fea:                    # rare path: one small padded copy
        x_p = jnp.pad(x_p, ((0, 0), (0, f_pad - in_fea)))

    # Pad batch to a multiple of G so the (batch, F) -> (R, 128) reshape is exact.
    # When batch % G == 0 (the realistic large-batch case) no copy is made.
    batch_p = _round_up(batch, g)
    if batch_p != batch:
        x_p = jnp.pad(x_p, ((0, batch_p - batch), (0, 0)))

    r = (batch_p * f_pad) // 128
    slab = x_p.reshape(r, 128)             # free row-major reshape (no transpose)

    # Block-replicated weight: wblk[grp*F + k, grp] = w[k], zero elsewhere. Tiny.
    w_flat = weight.reshape(-1).astype(dtype)
    if f_pad != in_fea:
        w_flat = jnp.pad(w_flat, (0, f_pad - in_fea))
    lane_grp = jnp.arange(128) // f_pad
    wblk = jnp.where(
        lane_grp[:, None] == jnp.arange(g)[None, :],
        jnp.tile(w_flat, g)[:, None],
        jnp.zeros((), dtype),
    ).astype(dtype)                        # (128, G)

    tile_r = _choose_tile_r(r, tile_r_max)
    grid = (pl.cdiv(r, tile_r),)

    cost = pl.CostEstimate(
        flops=2 * batch_p * f_pad,
        transcendentals=0,
        bytes_accessed=(batch_p * f_pad + 128 * g + batch_p) * itemsize,
    )

    out = pl.pallas_call(
        _linear_kernel,
        out_shape=jax.ShapeDtypeStruct((r, g), dtype),
        grid_spec=pltpu.PrefetchScalarGridSpec(
            num_scalar_prefetch=0,
            grid=grid,
            in_specs=[
                # x slab tile: (tile_r, 128) -- tile_r % 8 == 0, lane dim dense.
                pl.BlockSpec((tile_r, 128), lambda i: (i, 0)),
                # weight block: single full-extent block, resident across steps.
                pl.BlockSpec((128, g), lambda i: (0, 0)),
            ],
            out_specs=pl.BlockSpec((tile_r, g), lambda i: (i, 0)),
        ),
        compiler_params=pltpu.CompilerParams(
            dimension_semantics=("parallel",),
        ),
        cost_estimate=cost,
    )(slab, wblk)

    y = out.reshape(batch_p, 1)            # row-major (R, G) is batch order: free
    if batch_p != batch:
        y = y[:batch]                      # tiny output-only slice (rare path)
    return y


class MyModuleJAX:
    """Mirror of the PyTorch MyModule: Sequential(Linear(in_fea, 1, bias=False))."""

    def __init__(self, in_fea: int, key: jax.Array):
        # nn.Linear default init bound: U(-1/sqrt(in_fea), 1/sqrt(in_fea))
        bound = 1.0 / (in_fea ** 0.5)
        self.weight = jax.random.uniform(
            key, (1, in_fea), dtype=jnp.float32, minval=-bound, maxval=bound
        )

    def __call__(self, x: jax.Array) -> jax.Array:
        return linear_forward(x, self.weight)


if __name__ == "__main__":
    key = jax.random.PRNGKey(0)
    k_w, k_x, k_x2, k_w3, k_x3 = jax.random.split(key, 5)

    in_fea = 4   # e.g. polynomial features [x, x^2, x^3, x^4]
    batch = 8

    model = MyModuleJAX(in_fea, k_w)

    # Primary small check (single partial block).
    x = jax.random.normal(k_x, (batch, in_fea), dtype=jnp.float32)
    y = model(x)
    jax.block_until_ready(y)
    y_ref = jnp.dot(x, model.weight.T, precision=jax.lax.Precision.HIGHEST)
    assert y.shape == (batch, 1)
    assert jnp.allclose(y, y_ref, atol=2e-3, rtol=2e-3)

    # Multi-step grid + ragged final block + batch-padding path.
    batch2 = 8200
    x2 = jax.random.normal(k_x2, (batch2, in_fea), dtype=jnp.float32)
    y2 = linear_forward(x2, model.weight, tile_r_max=64)
    jax.block_until_ready(y2)
    y2_ref = jnp.dot(x2, model.weight.T, precision=jax.lax.Precision.HIGHEST)
    assert y2.shape == (batch2, 1)
    assert jnp.allclose(y2, y2_ref, atol=2e-3, rtol=2e-3)

    # Non-power-of-two feature count (feature-padding path).
    in_fea3, batch3 = 3, 100
    w3 = jax.random.uniform(k_w3, (1, in_fea3), jnp.float32, minval=-0.5, maxval=0.5)
    x3 = jax.random.normal(k_x3, (batch3, in_fea3), dtype=jnp.float32)
    y3 = linear_forward(x3, w3)
    jax.block_until_ready(y3)
    y3_ref = jnp.dot(x3, w3.T, precision=jax.lax.Precision.HIGHEST)
    assert y3.shape == (batch3, 1)
    assert jnp.allclose(y3, y3_ref, atol=2e-3, rtol=2e-3)

    print("KERNEL_OK")
</pallas_src>

<mosaic_0001>
module attributes {stable_mosaic.version = 11 : i64} {
  func.func @_linear_kernel(%arg0: i32, %arg1: memref<8x128xf32, #tpu.memory_space<vmem>>, %arg2: memref<128x32xf32, #tpu.memory_space<vmem>>, %arg3: memref<8x32xf32, #tpu.memory_space<vmem>>) attributes {dimension_semantics = [#tpu.dimension_semantics<parallel>], iteration_bounds = array<i64: 1>, scalar_prefetch = 0 : i64, scratch_operands = 0 : i64, tpu.core_type = #tpu.core_type<tc>, window_params = [{transform_indices = @transform_0, window_bounds = array<i64: 8, 128>}, {pipeline_mode = #tpu.pipeline_mode<synchronous>, transform_indices = @transform_1, window_bounds = array<i64: 128, 32>}, {transform_indices = @transform_2, window_bounds = array<i64: 8, 32>}]} {
    %c0 = arith.constant 0 : index
    %c0_0 = arith.constant 0 : index
    %0 = vector.load %arg1[%c0, %c0_0] : memref<8x128xf32, #tpu.memory_space<vmem>>, vector<8x128xf32>
    %c0_1 = arith.constant 0 : index
    %c0_2 = arith.constant 0 : index
    %1 = vector.load %arg2[%c0_1, %c0_2] : memref<128x32xf32, #tpu.memory_space<vmem>>, vector<128x32xf32>
    %cst = arith.constant dense<0.000000e+00> : vector<8x32xf32>
    %2 = tpu.matmul %0, %1, %cst {dimension_numbers = #tpu.dot_dimension_numbers<[1], [0], [0], [1], [0, 0, 1, 1], [], []>} : vector<8x128xf32>, vector<128x32xf32>, vector<8x32xf32> -> vector<8x32xf32>
    %c0_3 = arith.constant 0 : index
    %c0_4 = arith.constant 0 : index
    %3 = vector.load %arg3[%c0_3, %c0_4] : memref<8x32xf32, #tpu.memory_space<vmem>>, vector<8x32xf32>
    tpu.vector_store %arg3[%c0_3, %c0_4], %2 {strides = array<i32>} : memref<8x32xf32, #tpu.memory_space<vmem>>, vector<8x32xf32>,
    return
  }
  func.func @transform_0(%arg0: i32) -> (i32, i32) {
    %c0_i32 = arith.constant 0 : i32
    %c0_i32_0 = arith.constant 0 : i32
    return %arg0, %c0_i32 : i32, i32
  }
  func.func @transform_1(%arg0: i32) -> (i32, i32) {
    %c0_i32 = arith.constant 0 : i32
    %c0_i32_0 = arith.constant 0 : i32
    %c0_i32_1 = arith.constant 0 : i32
    return %c0_i32, %c0_i32_0 : i32, i32
  }
  func.func @transform_2(%arg0: i32) -> (i32, i32) {
    %c0_i32 = arith.constant 0 : i32
    %c0_i32_0 = arith.constant 0 : i32
    return %arg0, %c0_i32 : i32, i32
  }
}

</mosaic_0001>

<bundles_post_ra>
// kernel: tpu_custom_call.1
= control target key start
LH: loop header
LB: loop body
LE: loop exit
PB: predicated region body
PF: predicated region fallthrough
CT: control target
= control target key end

     0   :  { %7 = vsyncpa [#allocation3], 0  ;;  %v223_v2 = vmov 0.0|0.0   ;;  %vm224_vm0 = vmmov 0   ;;  %v225_v6 = vmov 0.0   ;;  %vm99_vm1 = vcmask 261120   ;;  %s307_s0 = inlined_call_operand.vmem [shape: f32[1,128], index: 0, kind: input, shape index: {}]   ;;  %s308_s1 = inlined_call_operand.vmem [shape: f32[128,32], index: 1, kind: input, shape index: {}]   ;;  %s309_s2 = inlined_call_operand.hbm [shape: f32[1,32], index: 2, kind: output, shape index: {}]  }
   0x1   :  { %v13_v0 = vld [vmem:[%s308_s1] sm:$0xff]  ;;  %v14_v1 = vld [vmem:[%s308_s1 + $0x8] sm:$0xff]  ;;  %169 = vmatprep.subr.bf16.mxu0 %v223_v2  ;;  %v15_v4 = vld [vmem:[%s308_s1 + $0x10] sm:$0xff]  ;;  %166 = vmatprep.mubr.msk.f32.mxu0 %vm224_vm0, %v225_v6 }
   0x2   :  { %v170_v3 = vpack.c.bf16 %v14_v1, %v13_v0  ;;  %v16_v5 = vld [vmem:[%s308_s1 + $0x18] sm:$0xff]  ;;  %v17_v8 = vld [vmem:[%s308_s1 + $0x20] sm:$0xff]  ;;  %v18_v9 = vld [vmem:[%s308_s1 + $0x28] sm:$0xff] }
   0x3   :  { %v173_v7 = vpack.c.bf16 %v16_v5, %v15_v4  ;;  %v176_v10 = vpack.c.bf16 %v18_v9, %v17_v8  ;;  %v19_v11 = vld [vmem:[%s308_s1 + $0x30] sm:$0xff]  ;;  %v20_v12 = vld [vmem:[%s308_s1 + $0x38] sm:$0xff]  ;;  %v21_v14 = vld [vmem:[%s308_s1 + $0x40] sm:$0xff] }
   0x4   :  { %171 = vmatpush3.bf16.msra.mxu0 %v170_v3  ;;  %v179_v13 = vpack.c.bf16 %v20_v12, %v19_v11  ;;  %v22_v15 = vld [vmem:[%s308_s1 + $0x48] sm:$0xff]  ;;  %v23_v17 = vld [vmem:[%s308_s1 + $0x50] sm:$0xff]  ;;  %v24_v18 = vld [vmem:[%s308_s1 + $0x58] sm:$0xff] }
   0x5   :  { %172 = vmatprep.subr.bf16.mxu0 %v223_v2  ;;  %v182_v16 = vpack.c.bf16 %v22_v15, %v21_v14  ;;  %v185_v19 = vpack.c.bf16 %v24_v18, %v23_v17  ;;  %v25_v20 = vld [vmem:[%s308_s1 + $0x60] sm:$0xff]  ;;  %v26_v21 = vld [vmem:[%s308_s1 + $0x68] sm:$0xff]  ;;  %v27_v23 = vld [vmem:[%s308_s1 + $0x70] sm:$0xff] }
   0x6   :  { %v188_v22 = vpack.c.bf16 %v26_v21, %v25_v20  ;;  %v28_v24 = vld [vmem:[%s308_s1 + $0x78] sm:$0xff]  ;;  %v12_v26 = vld [vmem:[%s307_s0] sm:$0xff] }
   0x7   :  { %v191_v25 = vpack.c.bf16 %v28_v24, %v27_v23 }
   0x8   :  { %174 = vmatpush3.bf16.msra.mxu0 %v173_v7 }
   0x9   :  { %175 = vmatprep.subr.bf16.mxu0 %v223_v2 }
   0xc   :  { %177 = vmatpush3.bf16.msra.mxu0 %v176_v10 }
   0xd   :  { %178 = vmatprep.subr.bf16.mxu0 %v223_v2 }
  0x10   :  { %180 = vmatpush3.bf16.msra.mxu0 %v179_v13 }
  0x11   :  { %181 = vmatprep.subr.bf16.mxu0 %v223_v2 }
  0x14   :  { %183 = vmatpush3.bf16.msra.mxu0 %v182_v16 }
  0x15   :  { %184 = vmatprep.subr.bf16.mxu0 %v223_v2 }
  0x18   :  { %186 = vmatpush3.bf16.msra.mxu0 %v185_v19 }
  0x19   :  { %187 = vmatprep.subr.bf16.mxu0 %v223_v2 }
  0x1c   :  { %189 = vmatpush3.bf16.msra.mxu0 %v188_v22 }
  0x1d   :  { %190 = vmatprep.subr.bf16.mxu0 %v223_v2 }
  0x20   :  { %192 = vmatpush3.bf16.msra.mxu0 %v191_v25 }
  0x23   :  { %167 = vmatmul.mubr.f32.vlgmr.msra.gmra.mrb[0].mxu0 %v12_v26 }
  0xf6   :  { %v95_v27 = vpop.f32.mrb[0].mxu0 }
  0xf7   :  { %100 = vst.msk [vmem:[#allocation2] sm:$0xff] %vm99_vm1, %v95_v27  ;;  %v168_v28 = vpop.f32.mrb[1].mxu0 }
  0xf8   :  { %105 = vsyncadd [#allocation3], 112  ;;  %s226_s15 = smov [#allocation2]  }
  0xf9   :  { %s106_s16 = sshll.u32 %s226_s15, 4  ;;  %s107_s16 = int_to_ptr.vmem [resolvable:$true] %s106_s16 }
  0xfa   :  { %s199_s17 = scalar_lea.vmem %s107_s16, 16  ;;  %s203_s1 = scalar_lea.vmem %s107_s16, 128 }
  0xfb   :  { %p200_p0 = scmp.ne.s32.totalorder %s107_s16, %s199_s17  ;;  %p204_p1 = scmp.lt.s32.totalorder %s107_s16, %s107_s16 }
  0xfc   :  { %p205_p2 = scmp.lt.s32.totalorder %s203_s1, %s199_s17 }
  0xfe   :  { %p206_p3 = por %p205_p2, %p204_p1 }
 0x100   :  { %p207_p4 = pnand %p206_p3, %p200_p0 }
 0x102   :  { %210 = shalt.err (!%p207_p4)
}
 0x103   :  { %s211_s0 = scalar_lea.hbm %s309_s2, 16 }
 0x104   :  { %p212_p5 = scmp.ne.s32.totalorder %s309_s2, %s211_s0  ;;  %p215_p6 = scmp.lt.u32.totalorder %s211_s0, %s309_s2 }
 0x106   :  { %p217_p7 = pnand %p215_p6, %p212_p5 }
 0x108   :  { %220 = shalt.err (!%p217_p7)
}
 0x109   :  { %s227_s24 = smov 16   ;;  %s228_s25 = smov 1  }
 0x10a   :  { %112 = dma.vmem_to_hbm [thread:$0]  %s107_s16, 16, %s309_s2, [#allocation3], %s227_s24, %s227_s24, %s228_s25  }
 0x10b   :  { %221 = dma.done.wait [#allocation3], 128  }
 0x10c   :  { %222 = vsyncadd [#allocation3], 4294967168 }
 0x10d   :  { %116 = vsyncpa [#allocation3], 1 }

</bundles_post_ra>
